<compile_context>
chip_gen: v6e
topology: v6e:2x2x1
jax: 0.10.0
libtpu: 0.0.40
codegen_flags: <defaults>
</compile_context>

<pallas_src>
import jax
import jax.numpy as jnp
from jax.experimental import pallas as pl
from jax.experimental.pallas import tpu as pltpu


def _round_up(n, m):
    return ((n + m - 1) // m) * m


def value_net_kernel(x_ref, w1_ref, b1_ref, w2_ref, b2_ref, o_ref):
    # x_ref:  (TB, S)  compute dtype (f32 or bf16)
    # w1_ref: (S, H)   compute dtype
    # b1_ref: (1, H)   f32
    # w2_ref: (1, H)   f32   (fc2 weight laid out as a lane row)
    # b2_ref: (1,)     f32, SMEM scalar
    # o_ref:  (1, TB)  f32   (lane-dense output row)
    x = x_ref[...]
    w1 = w1_ref[...]

    # fc1 on the MXU with f32 accumulation, then bias + ReLU on the VPU.
    h = jnp.dot(x, w1, preferred_element_type=jnp.float32)      # (TB, H)
    h = jnp.maximum(h + b1_ref[...], 0.0)                        # (TB, H)

    # fc2 (out_features == 1): VPU multiply + cross-lane reduce instead of an
    # MXU matmul that would use a single output column.
    v = jnp.sum(h * w2_ref[...], axis=-1)                        # (TB,)
    o_ref[...] = (v + b2_ref[0])[None, :].astype(o_ref.dtype)    # (1, TB)


def _vmem_limit_bytes(TB, S, H):
    """Rough double-buffered VMEM budget; explicit so v5e (16 MiB scoped
    default) and v7x (64 MiB physical) both behave predictably."""
    itemsize = 4
    x_buf = TB * _round_up(S, 128) * itemsize
    w1_buf = _round_up(S, 8) * _round_up(H, 128) * itemsize
    row_buf = 8 * _round_up(H, 128) * itemsize        # b1 row / w2 row
    out_buf = 8 * _round_up(TB, 128) * itemsize
    h_tmp = TB * _round_up(H, 128) * itemsize
    need = 2 * (x_buf + w1_buf + 2 * row_buf + out_buf) + h_tmp
    return int(min(64 * 2 ** 20, max(16 * 2 ** 20, 4 * need)))


def value_net_forward(x, w1, b1, w2, b2, *, block_b=512,
                      compute_dtype=jnp.float32):
    """ValueNet forward: relu(x @ w1 + b1) @ w2 + b2.

    x: (B, S) float32, w1: (S, H), b1: (H,), w2: (H, 1), b2: (1,).
    Returns (B, 1) float32.
    """
    B, S = x.shape
    H = w1.shape[1]

    # Batch tile size. The lane-dense (1, TB) output block requires TB to be a
    # multiple of 128 when there is more than one tile, or TB == padded batch
    # for the single-tile case.
    if _round_up(B, 8) <= block_b:
        TB = _round_up(B, 8)
    else:
        TB = _round_up(block_b, 128)
    B_pad = _round_up(B, TB)
    num_tiles = B_pad // TB

    if B_pad != B:
        x = jnp.pad(x, ((0, B_pad - B), (0, 0)))

    # Cast the dominant HBM stream (x) and w1 for the MXU; accumulation stays
    # f32 and the epilogue (bias, ReLU, reduce) stays f32 (safe on v5e too).
    x_in = x.astype(compute_dtype)
    w1_in = w1.astype(compute_dtype)
    b1_row = b1.reshape(1, H).astype(jnp.float32)
    w2_row = w2.reshape(1, H).astype(jnp.float32)
    b2_s = b2.reshape(1).astype(jnp.float32)

    out_row = pl.pallas_call(
        value_net_kernel,
        out_shape=jax.ShapeDtypeStruct((1, B_pad), jnp.float32),
        grid_spec=pltpu.PrefetchScalarGridSpec(
            num_scalar_prefetch=0,
            grid=(num_tiles,),
            in_specs=[
                # x: streamed per batch tile (pipelined / double-buffered).
                pl.BlockSpec((TB, S), lambda i: (i, 0)),
                # Weights / biases: constant block index -> stay resident.
                pl.BlockSpec((S, H), lambda i: (0, 0)),
                pl.BlockSpec((1, H), lambda i: (0, 0)),
                pl.BlockSpec((1, H), lambda i: (0, 0)),
                # b2: single scalar in SMEM.
                pl.BlockSpec(memory_space=pltpu.MemorySpace.SMEM),
            ],
            out_specs=pl.BlockSpec((1, TB), lambda i: (0, i)),
        ),
        compiler_params=pltpu.CompilerParams(
            dimension_semantics=("parallel",),
            vmem_limit_bytes=_vmem_limit_bytes(TB, S, H),
        ),
    )(x_in, w1_in, b1_row, w2_row, b2_s)

    return out_row[0, :B].reshape(B, 1)


def init_params(key, state_dim, hidden_dim):
    """Deterministic init mimicking torch.nn.Linear (uniform +-1/sqrt(fan_in)).

    Weights stored transposed vs torch ([in, out]) so the kernel computes
    x @ W + b directly.
    """
    k1, k2, k3, k4 = jax.random.split(key, 4)
    bound1 = 1.0 / jnp.sqrt(state_dim)
    bound2 = 1.0 / jnp.sqrt(hidden_dim)
    w1 = jax.random.uniform(k1, (state_dim, hidden_dim), jnp.float32,
                            -bound1, bound1)
    b1 = jax.random.uniform(k2, (hidden_dim,), jnp.float32, -bound1, bound1)
    w2 = jax.random.uniform(k3, (hidden_dim, 1), jnp.float32, -bound2, bound2)
    b2 = jax.random.uniform(k4, (1,), jnp.float32, -bound2, bound2)
    return w1, b1, w2, b2


if __name__ == "__main__":
    # Acrobot state_dim = 6; small batch / hidden for the demo.
    batch, state_dim, hidden_dim = 8, 6, 32

    key = jax.random.PRNGKey(0)
    kx, kxb, kp = jax.random.split(key, 3)
    x = jax.random.normal(kx, (batch, state_dim), jnp.float32)
    w1, b1, w2, b2 = init_params(kp, state_dim, hidden_dim)

    ref = jnp.maximum(x @ w1 + b1, 0.0) @ w2 + b2

    # 1) Small single-tile case, f32.
    out = jax.block_until_ready(value_net_forward(x, w1, b1, w2, b2))
    assert out.shape == (batch, 1)
    assert jnp.allclose(out, ref, atol=1e-5, rtol=1e-5)

    # 2) Multi-tile / padded-batch path (grid > 1), f32.
    big_b = 300
    xb = jax.random.normal(kxb, (big_b, state_dim), jnp.float32)
    refb = jnp.maximum(xb @ w1 + b1, 0.0) @ w2 + b2
    outb = jax.block_until_ready(
        value_net_forward(xb, w1, b1, w2, b2, block_b=128))
    assert outb.shape == (big_b, 1)
    assert jnp.allclose(outb, refb, atol=1e-5, rtol=1e-5)

    # 3) bf16 fast path for the x / w1 HBM stream (f32 accumulation).
    out16 = jax.block_until_ready(
        value_net_forward(x, w1, b1, w2, b2, compute_dtype=jnp.bfloat16))
    assert out16.shape == (batch, 1)
    assert jnp.allclose(out16, ref, atol=5e-2, rtol=5e-2)

    print("KERNEL_OK")
</pallas_src>

<mosaic_0001>
module attributes {stable_mosaic.version = 11 : i64} {
  func.func @value_net_kernel(%arg0: i32, %arg1: memref<8x6xf32, #tpu.memory_space<vmem>>, %arg2: memref<6x32xf32, #tpu.memory_space<vmem>>, %arg3: memref<1x32xf32, #tpu.memory_space<vmem>>, %arg4: memref<1x32xf32, #tpu.memory_space<vmem>>, %arg5: memref<1xf32, #tpu.memory_space<smem>>, %arg6: memref<1x8xf32, #tpu.memory_space<vmem>>) attributes {dimension_semantics = [#tpu.dimension_semantics<parallel>], iteration_bounds = array<i64: 1>, scalar_prefetch = 0 : i64, scratch_operands = 0 : i64, tpu.core_type = #tpu.core_type<tc>, window_params = [{transform_indices = @transform_0, window_bounds = array<i64: 8, 6>}, {pipeline_mode = #tpu.pipeline_mode<synchronous>, transform_indices = @transform_1, window_bounds = array<i64: 6, 32>}, {pipeline_mode = #tpu.pipeline_mode<synchronous>, transform_indices = @transform_2, window_bounds = array<i64: 1, 32>}, {pipeline_mode = #tpu.pipeline_mode<synchronous>, transform_indices = @transform_3, window_bounds = array<i64: 1, 32>}, {transform_indices = @transform_4, window_bounds = array<i64: 1>}, {transform_indices = @transform_5, window_bounds = array<i64: 1, 8>}]} {
    %c0 = arith.constant 0 : index
    %c0_0 = arith.constant 0 : index
    %0 = vector.load %arg1[%c0, %c0_0] : memref<8x6xf32, #tpu.memory_space<vmem>>, vector<8x6xf32>
    %c0_1 = arith.constant 0 : index
    %c0_2 = arith.constant 0 : index
    %1 = vector.load %arg2[%c0_1, %c0_2] : memref<6x32xf32, #tpu.memory_space<vmem>>, vector<6x32xf32>
    %cst = arith.constant dense<0.000000e+00> : vector<8x32xf32>
    %2 = tpu.matmul %0, %1, %cst {dimension_numbers = #tpu.dot_dimension_numbers<[1], [0], [0], [1], [0, 0, 1, 1], [], []>} : vector<8x6xf32>, vector<6x32xf32>, vector<8x32xf32> -> vector<8x32xf32>
    %c0_3 = arith.constant 0 : index
    %c0_4 = arith.constant 0 : index
    %3 = vector.load %arg3[%c0_3, %c0_4] : memref<1x32xf32, #tpu.memory_space<vmem>>, vector<1x32xf32>
    %4 = vector.broadcast %3 : vector<1x32xf32> to vector<8x32xf32>
    %5 = arith.addf %2, %4 : vector<8x32xf32>
    %cst_5 = arith.constant 0.000000e+00 : f32
    %6 = vector.broadcast %cst_5 : f32 to vector<8x32xf32>
    %7 = arith.maximumf %5, %6 : vector<8x32xf32>
    %c0_6 = arith.constant 0 : index
    %c0_7 = arith.constant 0 : index
    %8 = vector.load %arg4[%c0_6, %c0_7] : memref<1x32xf32, #tpu.memory_space<vmem>>, vector<1x32xf32>
    %9 = vector.broadcast %8 : vector<1x32xf32> to vector<8x32xf32>
    %10 = arith.mulf %7, %9 : vector<8x32xf32>
    %cst_8 = arith.constant dense<0.000000e+00> : vector<8xf32>
    %11 = vector.multi_reduction <add>, %10, %cst_8 [1] : vector<8x32xf32> to vector<8xf32>
    %c0_9 = arith.constant 0 : index
    %12 = memref.load %arg5[%c0_9] : memref<1xf32, #tpu.memory_space<smem>>
    %13 = vector.broadcast %12 : f32 to vector<8xf32>
    %14 = arith.addf %11, %13 : vector<8xf32>
    %15 = vector.shape_cast %14 : vector<8xf32> to vector<1x8xf32>
    %c0_10 = arith.constant 0 : index
    %c0_11 = arith.constant 0 : index
    %16 = vector.load %arg6[%c0_10, %c0_11] : memref<1x8xf32, #tpu.memory_space<vmem>>, vector<1x8xf32>
    tpu.vector_store %arg6[%c0_10, %c0_11], %15 {strides = array<i32>} : memref<1x8xf32, #tpu.memory_space<vmem>>, vector<1x8xf32>,
    return
  }
  func.func @transform_0(%arg0: i32) -> (i32, i32) {
    %c0_i32 = arith.constant 0 : i32
    %c0_i32_0 = arith.constant 0 : i32
    return %arg0, %c0_i32 : i32, i32
  }
  func.func @transform_1(%arg0: i32) -> (i32, i32) {
    %c0_i32 = arith.constant 0 : i32
    %c0_i32_0 = arith.constant 0 : i32
    %c0_i32_1 = arith.constant 0 : i32
    return %c0_i32, %c0_i32_0 : i32, i32
  }
  func.func @transform_2(%arg0: i32) -> (i32, i32) {
    %c0_i32 = arith.constant 0 : i32
    %c0_i32_0 = arith.constant 0 : i32
    %c0_i32_1 = arith.constant 0 : i32
    return %c0_i32, %c0_i32_0 : i32, i32
  }
  func.func @transform_3(%arg0: i32) -> (i32, i32) {
    %c0_i32 = arith.constant 0 : i32
    %c0_i32_0 = arith.constant 0 : i32
    %c0_i32_1 = arith.constant 0 : i32
    return %c0_i32, %c0_i32_0 : i32, i32
  }
  func.func @transform_4(%arg0: i32) -> i32 {
    %c0_i32 = arith.constant 0 : i32
    %c0_i32_0 = arith.constant 0 : i32
    return %c0_i32 : i32
  }
  func.func @transform_5(%arg0: i32) -> (i32, i32) {
    %c0_i32 = arith.constant 0 : i32
    %c0_i32_0 = arith.constant 0 : i32
    return %c0_i32, %arg0 : i32, i32
  }
}

</mosaic_0001>

<bundles_post_ra>
// kernel: tpu_custom_call.1
= control target key start
LH: loop header
LB: loop body
LE: loop exit
PB: predicated region body
PF: predicated region fallthrough
CT: control target
= control target key end

     0   :  { %11 = vsyncpa [#allocation4], 0  ;;  %s310_s0 = inlined_call_operand.hbm [shape: f32[8,6], index: 0, kind: input, shape index: {}]   ;;  %s311_s1 = inlined_call_operand.hbm [shape: f32[6,32], index: 1, kind: input, shape index: {}]   ;;  %s312_s2 = inlined_call_operand.vmem [shape: f32[1,32], index: 2, kind: input, shape index: {}]   ;;  %s313_s3 = inlined_call_operand.vmem [shape: f32[1,32], index: 3, kind: input, shape index: {}]   ;;  %s314_s4 = inlined_call_operand.<no memory space> [shape: f32[1], index: 4, kind: input, shape index: {}]   ;;  %s315_s5 = inlined_call_operand.hbm [shape: f32[1,8], index: 5, kind: output, shape index: {}]  }
   0x1   :  { %12 = vsyncpa [#allocation7], 0 }
   0x2   :  { %13 = vsyncpa [#allocation5], 0  ;;  %s257_s18 = smov [#allocation3]   ;;  %s258_s20 = smov [#allocation6]  }
   0x3   :  { %s20_s19 = sshll.u32 %s257_s18, 4  ;;  %s30_s21 = sshll.u32 %s258_s20, 4  ;;  %s21_s19 = int_to_ptr.vmem [resolvable:$true] %s20_s19  ;;  %s31_s21 = int_to_ptr.vmem [resolvable:$true] %s30_s21 }
   0x4   :  { %s199_s22 = scalar_lea.vmem %s21_s19, 128  ;;  %p204_p1 = scmp.lt.s32.totalorder %s21_s19, %s21_s19 }
   0x5   :  { %p200_p0 = scmp.ne.s32.totalorder %s21_s19, %s199_s22  ;;  %p205_p2 = scmp.lt.s32.totalorder %s199_s22, %s199_s22 }
   0x7   :  { %p206_p3 = por %p205_p2, %p204_p1 }
   0x9   :  { %p207_p4 = pnand %p206_p3, %p200_p0 }
   0xb   :  { %210 = shalt.err (!%p207_p4)
}
   0xc   :  { %23 = dma.hbm_to_vmem [thread:$0]  %s310_s0, 128, %s21_s19, [#allocation4]  }
   0xd   :  { %s219_s25 = scalar_lea.vmem %s31_s21, 128  ;;  %p224_p6 = scmp.lt.s32.totalorder %s31_s21, %s31_s21 }
   0xe   :  { %p220_p5 = scmp.ne.s32.totalorder %s31_s21, %s219_s25  ;;  %p225_p7 = scmp.lt.s32.totalorder %s219_s25, %s219_s25 }
  0x10   :  { %p226_p8 = por %p225_p7, %p224_p6 }
  0x12   :  { %p227_p9 = pnand %p226_p8, %p220_p5 }
  0x14   :  { %230 = shalt.err (!%p227_p9)
}
  0x15   :  { %33 = dma.hbm_to_vmem [thread:$0]  %s311_s1, 128, %s31_s21, [#allocation7]  }
  0x16   :  { %251 = dma.done.wait [#allocation4], 128  }
  0x17   :  { %252 = vsyncadd [#allocation4], 4294967168 }
  0x18   :  { %253 = dma.done.wait [#allocation7], 128  }
  0x19   :  { %254 = vsyncadd [#allocation7], 4294967168  ;;  %v259_v0 = vmov 0.0   ;;  %vm260_vm0 = vmmov 0   ;;  %vm59_vm1 = vcmask 1045504   ;;  %vm55_vm2 = vcmask 48128  }
  0x1a   :  { %181 = vmatprep.subr.mxu0 %v259_v0  ;;  %183 = vmatprep.mubr.msk.f32.mxu0 %vm260_vm0, %v259_v0  ;;  %v47_v1 = vld [vmem:[#allocation6] sm:$0x3f]  ;;  %v46_v2 = vld [vmem:[#allocation3] sm:$0xff]  ;;  %vm142_vm3 = vcmask 261120   ;;  %v150_v11 = vlaneseq  ;;  %v147_v14 = vstv %s314_s4  ;;  %vm157_vm4 = vcmask 57344  }
  0x1b   :  { %182 = vmatpush3.msk.msra.mxu0 %vm59_vm1, %v47_v1  ;;  %v175_v3 = vld [vmem:[%s312_s2] ss:$0 sm:$0xff]  ;;  %s261_s2 = smov [#allocation8]  }
  0x1c   :  { %184 = vmatmul.mubr.msk.f32.vlgmr.msra.gmra.mxu0 %vm55_vm2, %v46_v2  ;;  %v178_v7 = vld [vmem:[%s313_s3] ss:$0 sm:$0xff]  ;;  %v151_v12 = vand.u32 127, %v150_v11  ;;  %v153_v13 = vshrl.u32 %v150_v11, 7  ;;  %s165_s7 = sshll.u32 %s261_s2, 4  ;;  %s166_s7 = int_to_ptr.vmem [resolvable:$true] %s165_s7 }
  0x1d   :  { %s231_s3 = scalar_lea.vmem %s166_s7, 16  ;;  %s235_s8 = scalar_lea.vmem %s166_s7, 32 }
  0x1e   :  { %v154_v15 = vsub.s32 %v151_v12, %v153_v13  ;;  %p232_p10 = scmp.ne.s32.totalorder %s166_s7, %s231_s3  ;;  %p236_p11 = scmp.lt.s32.totalorder %s166_s7, %s166_s7 }
  0x1f   :  { %p237_p12 = scmp.lt.s32.totalorder %s235_s8, %s231_s3 }
  0x21   :  { %p238_p13 = por %p237_p12, %p236_p11 }
  0x23   :  { %p239_p0 = pnand %p238_p13, %p232_p10 }
  0xdc   :  { %v129_v4 = vpop.f32.mrf.mxu0 }
  0xdd   :  { %v130_v5 = vadd.f32 %v175_v3, %v129_v4 }
  0xde   :  { %v185_v6 = vpop.f32.mrf.mxu0 }
  0xdf   :  { %v133_v8 = vmax.f32 %v130_v5, 0.0 }
  0xe1   :  { %v141_v9 = vmul.f32 %v178_v7, %v133_v8 }
  0xe3   :  { %v143_v10 = vsel %vm142_vm3, %v141_v9, 0.0 }
  0xe4   :  { %144 = vadd.xlane.f32.xlu0 %v143_v10 }
 0x16d   :  { %v145_v16 = vpop.xlane.xlu0 %144 }
 0x16e   :  { %v148_v17 = vadd.f32 %v147_v14, %v145_v16 }
 0x170   :  { %v155_v18 = vrot.slane %v148_v17, %v154_v15 }
 0x172   :  { %158 = vst.msk [vmem:[#allocation8] sm:$0x1] %vm157_vm4, %v155_v18 }
 0x173   :  { %242 = shalt.err (!%p239_p0)
}
 0x174   :  { %168 = dma.vmem_to_hbm [thread:$0]  %s166_s7, 16, %s315_s5, [#allocation5]  }
 0x175   :  { %255 = dma.done.wait [#allocation5], 16  }
 0x176   :  { %256 = vsyncadd [#allocation5], 4294967280 }
 0x177   :  { %172 = vsyncpa [#allocation4], 1 }
 0x178   :  { %173 = vsyncpa [#allocation7], 1 }
 0x179   :  { %174 = vsyncpa [#allocation5], 1 }

</bundles_post_ra>
